<compile_context>
chip_gen: v7x
topology: tpu7x:2x2x1
jax: 0.10.0
libtpu: 0.0.40
codegen_flags: <defaults>
</compile_context>

<pallas_src>
import functools

import jax
import jax.numpy as jnp
from jax.experimental import pallas as pl
from jax.experimental.pallas import tpu as pltpu

EPS = 1e-6


def _vmem_capacity_bytes():
    """Per-core VMEM capacity; conservative fallback if the query fails."""
    try:
        return int(pltpu.get_tpu_info().vmem_capacity_bytes)
    except Exception:
        return 64 << 20  # v7x per-TC VMEM (smallest of the three generations)


def _dropout_check(dropout_p, training):
    if training and dropout_p > 0.0:
        # TODO(synk): training-mode dropout (pltpu.prng_seed + prng_random_bits
        # + mask in the finalize pl.when) not implemented.
        raise NotImplementedError(
            "training-mode dropout not implemented; eval-mode dropout is identity")


# ---------------------------------------------------------------------------
# Fused LayerNorm + Linear kernel
#   grid = (M_tiles, N_tiles, K_tiles), K innermost reduction.
#   x block      : (tm, H)  full hidden row (LN needs the whole row)
#   weight block : (tk, tn)
#   out block    : (tm, tn), resident across K, written at k == num_k-1
#   LN runs once per M row-block (at j == 0 & k == 0); normalized rows are
#   kept in a persistent VMEM scratch and reused for every N / K tile.
# ---------------------------------------------------------------------------
def _fused_ln_linear_kernel(x_ref, a_ref, b_ref, w_ref, bias_ref, o_ref,
                            xn_ref, *acc_refs, tk, num_k, approx_recip):
    j = pl.program_id(1)
    k = pl.program_id(2)

    # ---- LayerNorm on the full-H row tile, ONCE per M row-block ------------
    @pl.when((j == 0) & (k == 0))
    def _():
        x = x_ref[...].astype(jnp.float32)                        # (tm, H)
        h = x.shape[-1]
        mean = jnp.mean(x, axis=-1, keepdims=True)
        diff = x - mean
        # torch.Tensor.std default is unbiased (ddof=1); eps added to std.
        var = jnp.sum(diff * diff, axis=-1, keepdims=True) / (h - 1)
        inv = pl.reciprocal(jnp.sqrt(var) + EPS, approx=approx_recip)
        y = (diff * inv) * a_ref[...].astype(jnp.float32) \
            + b_ref[...].astype(jnp.float32)
        xn_ref[...] = y.astype(xn_ref.dtype)           # persists over (j, k)

    if num_k == 1:
        # ---- single-K fast path: no accumulator, write output directly -----
        o_ref[...] = (jnp.dot(xn_ref[...], w_ref[...],
                              preferred_element_type=jnp.float32)
                      + bias_ref[...].astype(jnp.float32)).astype(o_ref.dtype)
    else:
        acc_ref = acc_refs[0]

        @pl.when(k == 0)
        def _():
            acc_ref[...] = jnp.zeros_like(acc_ref)

        koff = pl.multiple_of(k * tk, tk)
        xn = xn_ref[:, pl.ds(koff, tk)]
        acc_ref[...] += jnp.dot(xn, w_ref[...],
                                preferred_element_type=jnp.float32)

        @pl.when(k == num_k - 1)
        def _():
            o_ref[...] = (acc_ref[...] +
                          bias_ref[...].astype(jnp.float32)).astype(o_ref.dtype)


def fused_layernorm_linear(x2d, a2, b2, w, bias, *,
                           tm=256, tn=256, tk=None,
                           mxu_dtype=jnp.bfloat16, out_dtype=None,
                           approx_recip=None, w_buffers=2):
    """out = LayerNorm(x2d) @ w + bias, fused in one pallas_call.

    Tile guidance: v5e -> tm=128..256; v6e -> tm up to 512 for long sequences
    (weight re-streamed once per M tile); v7x -> tm=256 (64 MiB VMEM).  Tiles
    auto-shrink if the VMEM estimate exceeds ~75% of the chip's VMEM.
    """
    R, H = x2d.shape
    Hk, Ho = w.shape
    assert Hk == H
    out_dtype = x2d.dtype if out_dtype is None else out_dtype
    if approx_recip is None:
        # Exact reciprocal only when doing full-f32 (verification) matmuls.
        approx_recip = jnp.dtype(mxu_dtype) != jnp.dtype(jnp.float32)

    # Larger default tk -> fewer accumulator RMW passes / grid steps.
    tk = min(H, 1024) if tk is None else tk
    tm, tn, tk = min(tm, R), min(tn, Ho), min(tk, H)
    assert R % tm == 0 and Ho % tn == 0 and H % tk == 0, \
        "pad rows / Ho / H to multiples of the chosen tiles"

    x_bytes = x2d.dtype.itemsize
    mxu_bytes = jnp.dtype(mxu_dtype).itemsize
    out_bytes = jnp.dtype(out_dtype).itemsize

    def _est(tm_, tn_, tk_):
        nk = H // tk_
        return (2 * tm_ * H * x_bytes                 # x, double-buffered
                + 2 * 2 * 8 * H * 4                   # gamma/beta, sublane-padded
                + w_buffers * tk_ * tn_ * mxu_bytes   # weight tiles
                + 2 * 8 * tn_ * 4                     # bias, sublane-padded
                + 2 * tm_ * tn_ * out_bytes           # output, double-buffered
                + tm_ * H * mxu_bytes                 # xn scratch
                + (tm_ * tn_ * 4 if nk > 1 else 0))   # f32 accumulator

    vmem_cap = (_vmem_capacity_bytes() * 3) // 4      # headroom for Mosaic scratch
    while _est(tm, tn, tk) > vmem_cap:
        if tm > 8 and tm % 2 == 0 and R % (tm // 2) == 0:
            tm //= 2
        elif tn > 128 and tn % 2 == 0 and Ho % (tn // 2) == 0:
            tn //= 2
        elif tk > 128 and tk % 2 == 0 and H % (tk // 2) == 0:
            tk //= 2
        else:
            break
    num_m, num_n, num_k = R // tm, Ho // tn, H // tk
    est = _est(tm, tn, tk)
    vmem_limit = min(vmem_cap, max(int(est * 3 // 2) + (4 << 20), 32 << 20))

    # Only cast when needed; pre-cast parameters at init time to avoid a
    # per-call f32->bf16 cast kernel over the whole weight matrix.
    w_in = w if w.dtype == jnp.dtype(mxu_dtype) else w.astype(mxu_dtype)

    kernel = functools.partial(_fused_ln_linear_kernel,
                               tk=tk, num_k=num_k, approx_recip=approx_recip)

    w_spec_kwargs = {}
    if w_buffers != 2:
        w_spec_kwargs["pipeline_mode"] = pl.Buffered(w_buffers)

    grid_spec = pltpu.PrefetchScalarGridSpec(
        num_scalar_prefetch=0,
        grid=(num_m, num_n, num_k),
        in_specs=[
            pl.BlockSpec((tm, H), lambda i, j, k: (i, 0)),      # x rows (full H)
            pl.BlockSpec((1, H), lambda i, j, k: (0, 0)),       # gamma
            pl.BlockSpec((1, H), lambda i, j, k: (0, 0)),       # beta
            pl.BlockSpec((tk, tn), lambda i, j, k: (k, j),      # W tile
                         **w_spec_kwargs),
            pl.BlockSpec((1, tn), lambda i, j, k: (0, j)),      # bias tile
        ],
        out_specs=pl.BlockSpec((tm, tn), lambda i, j, k: (i, j)),
        scratch_shapes=[pltpu.VMEM((tm, H), mxu_dtype)]          # normalized rows
                      + ([pltpu.VMEM((tm, tn), jnp.float32)]     # f32 accumulator
                         if num_k > 1 else []),
    )

    # Only M is megacore-sharded: required for the LN-once optimization
    # (the core that never sees j == 0 must not exist), harmless on 1-TC chips.
    cparams = pltpu.CompilerParams(
        dimension_semantics=("parallel", "arbitrary", "arbitrary"),
        vmem_limit_bytes=vmem_limit,
    )

    return pl.pallas_call(
        kernel,
        out_shape=jax.ShapeDtypeStruct((R, Ho), out_dtype),
        grid_spec=grid_spec,
        compiler_params=cparams,
    )(x2d, a2.reshape(1, H), b2.reshape(1, H), w_in, bias.reshape(1, Ho))


# ---------------------------------------------------------------------------
# Standalone LayerNorm kernel (for arbitrary, non-linear sublayers)
# ---------------------------------------------------------------------------
def _layernorm_kernel(x_ref, a_ref, b_ref, o_ref, *, approx_recip):
    x = x_ref[...].astype(jnp.float32)                            # (tile_rows, H)
    h = x.shape[-1]
    mean = jnp.mean(x, axis=-1, keepdims=True)
    diff = x - mean
    var = jnp.sum(diff * diff, axis=-1, keepdims=True) / (h - 1)  # unbiased
    inv = pl.reciprocal(jnp.sqrt(var) + EPS, approx=approx_recip)
    o_ref[...] = ((diff * inv) * a_ref[...].astype(jnp.float32)
                  + b_ref[...].astype(jnp.float32)).astype(o_ref.dtype)


def layernorm(x2d, a2, b2, *, tile_rows=512, approx_recip=False):
    """Row-tiled LayerNorm; mem-bound, so tiles are large, with explicit VMEM
    budgeting (shrinks tiles / sets vmem_limit_bytes per chip generation)."""
    R, H = x2d.shape
    tile_rows = min(tile_rows, R)
    x_bytes = x2d.dtype.itemsize

    def _est(tr):
        return 2 * tr * H * x_bytes * 2 + 2 * 2 * 8 * H * 4   # in + out dbl-buffered

    vmem_cap = (_vmem_capacity_bytes() * 3) // 4
    while (_est(tile_rows) > vmem_cap and tile_rows > 8
           and tile_rows % 2 == 0 and R % (tile_rows // 2) == 0):
        tile_rows //= 2
    assert R % tile_rows == 0, "pad rows to a multiple of tile_rows"
    vmem_limit = min(vmem_cap, max(int(_est(tile_rows) * 3 // 2) + (2 << 20),
                                   32 << 20))

    return pl.pallas_call(
        functools.partial(_layernorm_kernel, approx_recip=approx_recip),
        out_shape=jax.ShapeDtypeStruct((R, H), x2d.dtype),
        grid_spec=pltpu.PrefetchScalarGridSpec(
            num_scalar_prefetch=0,
            grid=(R // tile_rows,),
            in_specs=[
                pl.BlockSpec((tile_rows, H), lambda i: (i, 0)),
                pl.BlockSpec((1, H), lambda i: (0, 0)),
                pl.BlockSpec((1, H), lambda i: (0, 0)),
            ],
            out_specs=pl.BlockSpec((tile_rows, H), lambda i: (i, 0)),
        ),
        compiler_params=pltpu.CompilerParams(
            dimension_semantics=("parallel",),
            vmem_limit_bytes=vmem_limit),
    )(x2d, a2.reshape(1, H), b2.reshape(1, H))


# ---------------------------------------------------------------------------
# SublayerConnection forward (note: this module has NO residual add)
# ---------------------------------------------------------------------------
def sublayer_connection(x, sublayer, a2, b2, dropout_p=0.1, training=False):
    """Generic path: out = dropout(sublayer(LayerNorm(x))), arbitrary sublayer."""
    _dropout_check(dropout_p, training)
    B, S, H = x.shape
    normed = layernorm(x.reshape(B * S, H), a2, b2).reshape(B, S, H)
    return sublayer(normed)   # eval-mode dropout is identity


def sublayer_connection_linear(x, a2, b2, w, bias, *, mxu_dtype=jnp.bfloat16,
                               tm=256, tn=256, tk=None, w_buffers=2,
                               dropout_p=0.1, training=False):
    """Fast path when the sublayer is a Linear(H->Ho): LN fused into the matmul."""
    _dropout_check(dropout_p, training)
    B, S, H = x.shape
    out = fused_layernorm_linear(x.reshape(B * S, H), a2, b2, w, bias,
                                 tm=tm, tn=tn, tk=tk, mxu_dtype=mxu_dtype,
                                 out_dtype=x.dtype, w_buffers=w_buffers)
    return out.reshape(B, S, w.shape[1])   # eval-mode dropout is identity


# ---------------------------------------------------------------------------
# Pure-JAX reference
# ---------------------------------------------------------------------------
def _ref_forward(x, a2, b2, w, b):
    mean = x.mean(-1, keepdims=True)
    diff = x - mean
    var = (diff * diff).sum(-1, keepdims=True) / (x.shape[-1] - 1)
    std = jnp.sqrt(var)
    normed = a2 * diff / (std + EPS) + b2
    return normed @ w + b


if __name__ == "__main__":
    key = jax.random.PRNGKey(0)

    # ------------------ Test 1: small shapes, single-K fast path ------------
    B, S, H = 2, 8, 32
    kx, kw, kb = jax.random.split(key, 3)
    x = jax.random.normal(kx, (B, S, H), dtype=jnp.float32)

    # LayerNorm params (as in __init__: ones / zeros)
    a2 = jnp.ones((H,), dtype=jnp.float32)
    b2 = jnp.zeros((H,), dtype=jnp.float32)

    # Deterministic example sublayer: Linear(H -> H)
    w = jax.random.normal(kw, (H, H), dtype=jnp.float32) * 0.05
    b = jax.random.normal(kb, (H,), dtype=jnp.float32) * 0.01

    ref = _ref_forward(x, a2, b2, w, b)

    # 1a) Fused LN+Linear, f32 MXU operands -> tight-tolerance check.
    out_f32 = jax.block_until_ready(
        sublayer_connection_linear(x, a2, b2, w, b, mxu_dtype=jnp.float32))
    assert out_f32.shape == (B, S, H)
    assert jnp.allclose(out_f32, ref, atol=1e-4, rtol=1e-4)

    # 1b) Fused LN+Linear, bf16 MXU operands (production path, f32 accumulate,
    #     approx reciprocal on the EUP).
    out_bf16 = jax.block_until_ready(
        sublayer_connection_linear(x, a2, b2, w, b, mxu_dtype=jnp.bfloat16))
    assert jnp.allclose(out_bf16, ref, atol=5e-2, rtol=5e-2)

    # ------ Test 2: exercises LN-once-per-M-block and the K-accumulator -----
    H2, Ho2 = 256, 256
    k2x, k2w, k2b = jax.random.split(jax.random.PRNGKey(1), 3)
    x2 = jax.random.normal(k2x, (B, S, H2), dtype=jnp.float32)
    g2 = jnp.ones((H2,), dtype=jnp.float32)
    beta2 = jnp.zeros((H2,), dtype=jnp.float32)
    w2 = jax.random.normal(k2w, (H2, Ho2), dtype=jnp.float32) * 0.05
    bias2 = jax.random.normal(k2b, (Ho2,), dtype=jnp.float32) * 0.01
    ref2 = _ref_forward(x2, g2, beta2, w2, bias2)
    out2 = jax.block_until_ready(
        sublayer_connection_linear(x2, g2, beta2, w2, bias2,
                                   mxu_dtype=jnp.float32,
                                   tm=16, tn=128, tk=128))   # grid (1, 2, 2)
    assert jnp.allclose(out2, ref2, atol=1e-3, rtol=1e-3)

    # ---- Test 3: generic path: standalone Pallas LN + arbitrary sublayer ---
    def sublayer(z):
        return jnp.einsum("bsh,hk->bsk", z, w) + b

    out_gen = jax.block_until_ready(sublayer_connection(x, sublayer, a2, b2))
    assert jnp.allclose(out_gen, ref, atol=1e-4, rtol=1e-4)

    print("KERNEL_OK")
</pallas_src>

<mosaic_0001>
module attributes {stable_mosaic.version = 11 : i64} {
  func.func @_fused_ln_linear_kernel(%arg0: i32, %arg1: i32, %arg2: i32, %arg3: memref<16x32xf32, #tpu.memory_space<vmem>>, %arg4: memref<1x32xf32, #tpu.memory_space<vmem>>, %arg5: memref<1x32xf32, #tpu.memory_space<vmem>>, %arg6: memref<32x32xf32, #tpu.memory_space<vmem>>, %arg7: memref<1x32xf32, #tpu.memory_space<vmem>>, %arg8: memref<16x32xf32, #tpu.memory_space<vmem>>, %arg9: memref<16x32xf32, #tpu.memory_space<vmem>>) attributes {dimension_semantics = [#tpu.dimension_semantics<parallel>, #tpu.dimension_semantics<arbitrary>, #tpu.dimension_semantics<arbitrary>], iteration_bounds = array<i64: 1, 1, 1>, scalar_prefetch = 0 : i64, scratch_operands = 1 : i64, tpu.core_type = #tpu.core_type<tc>, window_params = [{transform_indices = @transform_0, window_bounds = array<i64: 16, 32>}, {pipeline_mode = #tpu.pipeline_mode<synchronous>, transform_indices = @transform_1, window_bounds = array<i64: 1, 32>}, {pipeline_mode = #tpu.pipeline_mode<synchronous>, transform_indices = @transform_2, window_bounds = array<i64: 1, 32>}, {transform_indices = @transform_3, window_bounds = array<i64: 32, 32>}, {transform_indices = @transform_4, window_bounds = array<i64: 1, 32>}, {transform_indices = @transform_5, window_bounds = array<i64: 16, 32>}]} {
    %c0_i32 = arith.constant 0 : i32
    %0 = arith.cmpi eq, %arg1, %c0_i32 : i32
    %c0_i32_0 = arith.constant 0 : i32
    %1 = arith.cmpi eq, %arg2, %c0_i32_0 : i32
    %2 = arith.andi %0, %1 : i1
    %3 = arith.extui %2 : i1 to i32
    %c0_i32_1 = arith.constant 0 : i32
    %4 = arith.cmpi ne, %3, %c0_i32_1 : i32
    scf.if %4 {
      %c0_9 = arith.constant 0 : index
      %c0_10 = arith.constant 0 : index
      %12 = vector.load %arg3[%c0_9, %c0_10] : memref<16x32xf32, #tpu.memory_space<vmem>>, vector<16x32xf32>
      %cst_11 = arith.constant dense<0.000000e+00> : vector<16xf32>
      %13 = vector.multi_reduction <add>, %12, %cst_11 [1] : vector<16x32xf32> to vector<16xf32>
      %14 = vector.shape_cast %13 : vector<16xf32> to vector<16x1xf32>
      %cst_12 = arith.constant 3.200000e+01 : f32
      %15 = vector.broadcast %cst_12 : f32 to vector<16x1xf32>
      %16 = arith.divf %14, %15 : vector<16x1xf32>
      %17 = vector.broadcast %16 : vector<16x1xf32> to vector<16x32xf32>
      %18 = arith.subf %12, %17 : vector<16x32xf32>
      %19 = arith.mulf %18, %18 : vector<16x32xf32>
      %cst_13 = arith.constant dense<0.000000e+00> : vector<16xf32>
      %20 = vector.multi_reduction <add>, %19, %cst_13 [1] : vector<16x32xf32> to vector<16xf32>
      %21 = vector.shape_cast %20 : vector<16xf32> to vector<16x1xf32>
      %cst_14 = arith.constant 3.100000e+01 : f32
      %22 = vector.broadcast %cst_14 : f32 to vector<16x1xf32>
      %23 = arith.divf %21, %22 : vector<16x1xf32>
      %24 = math.sqrt %23 : vector<16x1xf32>
      %cst_15 = arith.constant 9.99999997E-7 : f32
      %25 = vector.broadcast %cst_15 : f32 to vector<16x1xf32>
      %26 = arith.addf %24, %25 : vector<16x1xf32>
      %27 = tpu.reciprocal %26 : vector<16x1xf32> -> vector<16x1xf32>
      %28 = vector.broadcast %27 : vector<16x1xf32> to vector<16x32xf32>
      %29 = arith.mulf %18, %28 : vector<16x32xf32>
      %c0_16 = arith.constant 0 : index
      %c0_17 = arith.constant 0 : index
      %30 = vector.load %arg4[%c0_16, %c0_17] : memref<1x32xf32, #tpu.memory_space<vmem>>, vector<1x32xf32>
      %31 = vector.broadcast %30 : vector<1x32xf32> to vector<16x32xf32>
      %32 = arith.mulf %29, %31 : vector<16x32xf32>
      %c0_18 = arith.constant 0 : index
      %c0_19 = arith.constant 0 : index
      %33 = vector.load %arg5[%c0_18, %c0_19] : memref<1x32xf32, #tpu.memory_space<vmem>>, vector<1x32xf32>
      %34 = vector.broadcast %33 : vector<1x32xf32> to vector<16x32xf32>
      %35 = arith.addf %32, %34 : vector<16x32xf32>
      %c0_20 = arith.constant 0 : index
      %c0_21 = arith.constant 0 : index
      %36 = vector.load %arg9[%c0_20, %c0_21] : memref<16x32xf32, #tpu.memory_space<vmem>>, vector<16x32xf32>
      tpu.vector_store %arg9[%c0_20, %c0_21], %35 {strides = array<i32>} : memref<16x32xf32, #tpu.memory_space<vmem>>, vector<16x32xf32>,
    } else {
    }
    %c0 = arith.constant 0 : index
    %c0_2 = arith.constant 0 : index
    %5 = vector.load %arg9[%c0, %c0_2] : memref<16x32xf32, #tpu.memory_space<vmem>>, vector<16x32xf32>
    %c0_3 = arith.constant 0 : index
    %c0_4 = arith.constant 0 : index
    %6 = vector.load %arg6[%c0_3, %c0_4] : memref<32x32xf32, #tpu.memory_space<vmem>>, vector<32x32xf32>
    %cst = arith.constant dense<0.000000e+00> : vector<16x32xf32>
    %7 = tpu.matmul %5, %6, %cst {dimension_numbers = #tpu.dot_dimension_numbers<[1], [0], [0], [1], [0, 0, 1, 1], [], []>} : vector<16x32xf32>, vector<32x32xf32>, vector<16x32xf32> -> vector<16x32xf32>
    %c0_5 = arith.constant 0 : index
    %c0_6 = arith.constant 0 : index
    %8 = vector.load %arg7[%c0_5, %c0_6] : memref<1x32xf32, #tpu.memory_space<vmem>>, vector<1x32xf32>
    %9 = vector.broadcast %8 : vector<1x32xf32> to vector<16x32xf32>
    %10 = arith.addf %7, %9 : vector<16x32xf32>
    %c0_7 = arith.constant 0 : index
    %c0_8 = arith.constant 0 : index
    %11 = vector.load %arg8[%c0_7, %c0_8] : memref<16x32xf32, #tpu.memory_space<vmem>>, vector<16x32xf32>
    tpu.vector_store %arg8[%c0_7, %c0_8], %10 {strides = array<i32>} : memref<16x32xf32, #tpu.memory_space<vmem>>, vector<16x32xf32>,
    return
  }
  func.func @transform_0(%arg0: i32, %arg1: i32, %arg2: i32) -> (i32, i32) {
    %c0_i32 = arith.constant 0 : i32
    %c0_i32_0 = arith.constant 0 : i32
    return %arg0, %c0_i32 : i32, i32
  }
  func.func @transform_1(%arg0: i32, %arg1: i32, %arg2: i32) -> (i32, i32) {
    %c0_i32 = arith.constant 0 : i32
    %c0_i32_0 = arith.constant 0 : i32
    %c0_i32_1 = arith.constant 0 : i32
    return %c0_i32, %c0_i32_0 : i32, i32
  }
  func.func @transform_2(%arg0: i32, %arg1: i32, %arg2: i32) -> (i32, i32) {
    %c0_i32 = arith.constant 0 : i32
    %c0_i32_0 = arith.constant 0 : i32
    %c0_i32_1 = arith.constant 0 : i32
    return %c0_i32, %c0_i32_0 : i32, i32
  }
  func.func @transform_3(%arg0: i32, %arg1: i32, %arg2: i32) -> (i32, i32) {
    %c0_i32 = arith.constant 0 : i32
    return %arg2, %arg1 : i32, i32
  }
  func.func @transform_4(%arg0: i32, %arg1: i32, %arg2: i32) -> (i32, i32) {
    %c0_i32 = arith.constant 0 : i32
    %c0_i32_0 = arith.constant 0 : i32
    return %c0_i32, %arg1 : i32, i32
  }
  func.func @transform_5(%arg0: i32, %arg1: i32, %arg2: i32) -> (i32, i32) {
    %c0_i32 = arith.constant 0 : i32
    return %arg0, %arg1 : i32, i32
  }
}

</mosaic_0001>

<bundles_post_ra>
// kernel: tpu_custom_call.1
= control target key start
LH: loop header
LB: loop body
LE: loop exit
PB: predicated region body
PF: predicated region fallthrough
CT: control target
= control target key end

     0   :  { %10 = vsyncpa [#allocation4], 0  ;;  %s449_s0 = inlined_call_operand.hbm [shape: f32[16,32], index: 0, kind: input, shape index: {}]   ;;  %s450_s1 = inlined_call_operand.vmem [shape: f32[1,32], index: 1, kind: input, shape index: {}]   ;;  %s451_s2 = inlined_call_operand.vmem [shape: f32[1,32], index: 2, kind: input, shape index: {}]   ;;  %s452_s3 = inlined_call_operand.hbm [shape: f32[32,32], index: 3, kind: input, shape index: {}]   ;;  %s453_s4 = inlined_call_operand.vmem [shape: f32[1,32], index: 4, kind: input, shape index: {}]   ;;  %s454_s5 = inlined_call_operand.hbm [shape: f32[16,32], index: 5, kind: output, shape index: {}]  }
   0x1   :  { %11 = vsyncpa [#allocation7], 0 }
   0x2   :  { %12 = vsyncpa [#allocation5], 0  ;;  %s350_s18 = smov [#allocation3]   ;;  %s278_s22 = scalar_lea.hbm %s449_s0, 256 }
   0x3   :  { %s18_s19 = sshll.u32 %s350_s18, 4  ;;  %p279_p0 = scmp.ne.s32.totalorder %s449_s0, %s278_s22  ;;  %s19_s19 = int_to_ptr.vmem [resolvable:$true] %s18_s19 }
   0x4   :  { %p282_p1 = scmp.lt.u32.totalorder %s278_s22, %s449_s0 }
   0x6   :  { %p284_p2 = pnand %p282_p1, %p279_p0 }
   0x8   :  { %287 = shalt.err (!%p284_p2)
}
   0x9   :  { %s288_s27 = scalar_lea.vmem %s19_s19, 256  ;;  %p293_p4 = scmp.lt.s32.totalorder %s19_s19, %s19_s19 }
   0xa   :  { %p289_p3 = scmp.ne.s32.totalorder %s19_s19, %s288_s27  ;;  %p294_p5 = scmp.lt.s32.totalorder %s288_s27, %s288_s27 }
   0xc   :  { %p295_p6 = por %p294_p5, %p293_p4 }
   0xe   :  { %p296_p7 = pnand %p295_p6, %p289_p3 }
  0x10   :  { %299 = shalt.err (!%p296_p7)
}
  0x11   :  { %s351_s28 = smov 128   ;;  %s352_s29 = smov 8  }
  0x12   :  { %24 = dma.hbm_to_vmem [thread:$0]  %s449_s0, 256, %s19_s19, [#allocation4], %s351_s28, %s351_s28, %s352_s29  }
  0x13   :  { %s353_s7 = smov [#allocation6]   ;;  %s300_s11 = scalar_lea.hbm %s452_s3, 512 }
  0x14   :  { %s34_s8 = sshll.u32 %s353_s7, 4  ;;  %p301_p8 = scmp.ne.s32.totalorder %s452_s3, %s300_s11  ;;  %s35_s8 = int_to_ptr.vmem [resolvable:$true] %s34_s8 }
  0x15   :  { %p304_p9 = scmp.lt.u32.totalorder %s300_s11, %s452_s3 }
  0x17   :  { %p306_p10 = pnand %p304_p9, %p301_p8 }
  0x19   :  { %309 = shalt.err (!%p306_p10)
}
  0x1a   :  { %s310_s16 = scalar_lea.vmem %s35_s8, 512  ;;  %p315_p12 = scmp.lt.s32.totalorder %s35_s8, %s35_s8 }
  0x1b   :  { %p311_p11 = scmp.ne.s32.totalorder %s35_s8, %s310_s16  ;;  %p316_p13 = scmp.lt.s32.totalorder %s310_s16, %s310_s16 }
  0x1d   :  { %p317_p0 = por %p316_p13, %p315_p12 }
  0x1f   :  { %p318_p1 = pnand %p317_p0, %p311_p11 }
  0x21   :  { %321 = shalt.err (!%p318_p1)
}
  0x22   :  { %40 = dma.hbm_to_vmem [thread:$0]  %s452_s3, 512, %s35_s8, [#allocation7], %s351_s28, %s351_s28, %s352_s29  }
  0x23   :  { %344 = dma.done.wait [#allocation4], 256  }
  0x24   :  { %345 = vsyncadd [#allocation4], 4294967040 }
  0x25   :  { %346 = dma.done.wait [#allocation7], 512  }
  0x26   :  { %347 = vsyncadd [#allocation7], 4294966784  ;;  %vm57_vm0 = vcmask 261120   ;;  %v55_v0 = vld [vmem:[#allocation3] sm:$0xff]  ;;  %v56_v1 = vld [vmem:[#allocation3 + $0x8] sm:$0xff] }
  0x27   :  { %v58_v2 = vsel %vm57_vm0, %v55_v0, 0.0  ;;  %v61_v3 = vsel %vm57_vm0, %v56_v1, 0.0  ;;  %v122_v14 = vld [vmem:[#allocation6] sm:$0xff]  ;;  %v123_v15 = vld [vmem:[#allocation6 + $0x8] sm:$0xff]  ;;  %v124_v17 = vld [vmem:[#allocation6 + $0x10] sm:$0xff] }
  0x28   :  { %59 = vadd.xlane.f32.xlu0 %v58_v2  ;;  %v257_v16 = vpack.c.bf16 %v123_v15, %v122_v14  ;;  %v125_v18 = vld [vmem:[#allocation6 + $0x18] sm:$0xff]  ;;  %v235_v37 = vld [vmem:[%s450_s1] ss:$0 sm:$0xff] }
  0x29   :  { %v261_v19 = vpack.c.bf16 %v125_v18, %v124_v17  ;;  %v236_v39 = vld [vmem:[%s451_s2] ss:$0 sm:$0xff]  ;;  %s354_s2 = smov [#allocation8]  }
  0x2a   :  { %258 = vmatprep.subr.bf16.mxu0 %v257_v16  ;;  %v237_v48 = vld [vmem:[%s453_s4] ss:$0 sm:$0xff]  ;;  %s222_s22 = sshll.u32 %s354_s2, 4  ;;  %s223_s22 = int_to_ptr.vmem [resolvable:$true] %s222_s22 }
  0x2b   :  { %260 = vmatpush3.bf16.msra.mxu0 %v257_v16  ;;  %s322_s23 = scalar_lea.vmem %s223_s22, 256  ;;  %p327_p3 = scmp.lt.s32.totalorder %s223_s22, %s223_s22 }
  0x2c   :  { %62 = vadd.xlane.f32.xlu0 %v61_v3  ;;  %262 = vmatprep.subr.bf16.mxu0 %v261_v19  ;;  %p323_p2 = scmp.ne.s32.totalorder %s223_s22, %s322_s23  ;;  %p328_p4 = scmp.lt.s32.totalorder %s322_s23, %s322_s23 }
  0x2e   :  { %p329_p5 = por %p328_p4, %p327_p3 }
  0x2f   :  { %264 = vmatpush3.bf16.msra.mxu0 %v261_v19 }
  0x30   :  { %p330_p6 = pnand %p329_p5, %p323_p2 }
  0xb5   :  { %v60_v4 = vpop.xlane.xlu0 %59 }
  0xb6   :  { %v65_v5 = vmul.f32 0.03125, %v60_v4 }
  0xb8   :  { %v67_v6 = vsub.f32 %v55_v0, %v65_v5 }
  0xb9   :  { %v63_v7 = vpop.xlane.xlu0 %62 }
  0xba   :  { %v66_v8 = vmul.f32 0.03125, %v63_v7  ;;  %v69_v9 = vmul.f32 %v67_v6, %v67_v6 }
  0xbc   :  { %v68_v10 = vsub.f32 %v56_v1, %v66_v8  ;;  %v71_v11 = vsel %vm57_vm0, %v69_v9, 0.0 }
  0xbd   :  { %72 = vadd.xlane.f32.xlu1 %v71_v11 }
  0xbe   :  { %v70_v12 = vmul.f32 %v68_v10, %v68_v10 }
  0xc0   :  { %v74_v13 = vsel %vm57_vm0, %v70_v12, 0.0 }
  0xc1   :  { %75 = vadd.xlane.f32.xlu1 %v74_v13 }
 0x14a   :  { %v73_v20 = vpop.xlane.xlu1 %72 }
 0x14b   :  { %v78_v21 = vmul.f32 0.032258064, %v73_v20 }
 0x14d   :  { %270 = vrsqrt.f32 %v78_v21  ;;  %vm82_vm1 = vcmp.eq.f32.partialorder %v78_v21, inf  ;;  %v85_v26 = vand.u32 2147483648, %v78_v21  ;;  %vm84_vm2 = vcmp.eq.f32.partialorder %v78_v21, 0.0 }
 0x14e   :  { %v76_v22 = vpop.xlane.xlu1 %75 }
 0x14f   :  { %v79_v23 = vmul.f32 0.032258064, %v76_v22 }
 0x151   :  { %272 = vrsqrt.f32 %v79_v23  ;;  %vm89_vm3 = vcmp.eq.f32.partialorder %v79_v23, inf  ;;  %v92_v32 = vand.u32 2147483648, %v79_v23  ;;  %vm91_vm4 = vcmp.eq.f32.partialorder %v79_v23, 0.0 }
 0x157   :  { %v271_v24 = vpop.eup %270 }
 0x158   :  { %v81_v25 = vmul.f32 %v271_v24, %v78_v21 }
 0x15a   :  { %v83_v27 = vsel %vm82_vm1, %v78_v21, %v81_v25 }
 0x15b   :  { %v273_v28 = vpop.eup %272  ;;  %v86_v29 = vsel %vm84_vm2, %v85_v26, %v83_v27 }
 0x15c   :  { %v94_v30 = vadd.f32 1e-06, %v86_v29  ;;  %v88_v31 = vmul.f32 %v273_v28, %v79_v23 }
 0x15e   :  { %274 = vrcp.f32 %v94_v30  ;;  %v90_v33 = vsel %vm89_vm3, %v79_v23, %v88_v31 }
 0x15f   :  { %v93_v34 = vsel %vm91_vm4, %v92_v32, %v90_v33 }
 0x160   :  { %v95_v35 = vadd.f32 1e-06, %v93_v34 }
 0x162   :  { %276 = vrcp.f32 %v95_v35 }
 0x168   :  { %v275_v36 = vpop.eup %274 }
 0x169   :  { %v98_v38 = vmul.f32 %v275_v36, %v67_v6 }
 0x16b   :  { %v107_v40 = vmul.f32 %v235_v37, %v98_v38 }
 0x16c   :  { %v277_v41 = vpop.eup %276 }
 0x16d   :  { %v116_v42 = vadd.f32 %v236_v39, %v107_v40  ;;  %v99_v43 = vmul.f32 %v277_v41, %v68_v10 }
 0x16f   :  { %118 = vst.msk [vmem:[#allocation2] sm:$0xff] %vm57_vm0, %v116_v42  ;;  %v108_v44 = vmul.f32 %v235_v37, %v99_v43 }
 0x171   :  { %v117_v45 = vadd.f32 %v236_v39, %v108_v44 }
 0x173   :  { %119 = vst.msk [vmem:[#allocation2 + $0x8] sm:$0xff] %vm57_vm0, %v117_v45 }
 0x176   :  { %v120_v46 = vld [vmem:[#allocation2] sm:$0xff] }
 0x177   :  { %254 = vmatprep.mubr.msk.f32.mxu0 %vm57_vm0, %v120_v46 }
 0x17a   :  { %v121_v47 = vld [vmem:[#allocation2 + $0x8] sm:$0xff] }
 0x17b   :  { %255 = vmatmul.mubr.msk.f32.vlgmr.msra.gmra.mrb[0].mxu0 %vm57_vm0, %v121_v47 }
 0x24e   :  { %v256_v49 = vpop.f32.mrb[0].mxu0 }
 0x24f   :  { %v212_v50 = vadd.f32 %v256_v49, %v237_v48  ;;  %v206_v51 = vpop.f32.mrb[1].mxu0 }
 0x250   :  { %v207_v52 = vadd.f32 %v237_v48, %v206_v51 }
 0x251   :  { %216 = vst.msk [vmem:[#allocation8 + $0x8] sm:$0xff] %vm57_vm0, %v212_v50 }
 0x252   :  { %215 = vst.msk [vmem:[#allocation8] sm:$0xff] %vm57_vm0, %v207_v52 }
 0x253   :  { %333 = shalt.err (!%p330_p6)
}
 0x254   :  { %s334_s25 = scalar_lea.hbm %s454_s5, 256 }
 0x255   :  { %p335_p7 = scmp.ne.s32.totalorder %s454_s5, %s334_s25  ;;  %p338_p8 = scmp.lt.u32.totalorder %s334_s25, %s454_s5 }
 0x257   :  { %p340_p9 = pnand %p338_p8, %p335_p7 }
 0x259   :  { %343 = shalt.err (!%p340_p9)
}
 0x25a   :  { %228 = dma.vmem_to_hbm [thread:$0]  %s223_s22, 256, %s454_s5, [#allocation5], %s351_s28, %s351_s28, %s352_s29  }
 0x25b   :  { %348 = dma.done.wait [#allocation5], 256  }
 0x25c   :  { %349 = vsyncadd [#allocation5], 4294967040 }
 0x25d   :  { %232 = vsyncpa [#allocation4], 1 }
 0x25e   :  { %233 = vsyncpa [#allocation7], 1 }
 0x25f   :  { %234 = vsyncpa [#allocation5], 1 }

</bundles_post_ra>
